<compile_context>
chip_gen: v7x
topology: tpu7x:2x2x1
jax: 0.10.0
libtpu: 0.0.40
codegen_flags: <defaults>
</compile_context>

<pallas_src>
import functools

import jax
import jax.numpy as jnp
from jax.experimental import pallas as pl
from jax.experimental.pallas import tpu as pltpu

_EPS = 1e-8


def _round_up(x, m):
    return ((x + m - 1) // m) * m


def _cdiv(a, b):
    return -(-a // b)


def _vmem_capacity_bytes():
    try:
        info = pltpu.get_tpu_info()
        for attr in ("vmem_capacity_bytes", "vmem_bytes"):
            cap = getattr(info, attr, None)
            if cap:
                return int(cap)
    except Exception:
        pass
    return 64 * 1024 * 1024  # conservative: v7x per-TensorCore VMEM


_VMEM_CAP = _vmem_capacity_bytes()
# Tile-selection budget and scoped VMEM limit, generation-aware:
#   v5e/v6e (128 MiB): 40 / 48 MiB;  v7x (64 MiB/TC): ~27 / 32 MiB.
_VMEM_BUDGET = min(int(0.42 * _VMEM_CAP), 40 * 1024 * 1024)
_VMEM_LIMIT = min(_VMEM_CAP // 2, 48 * 1024 * 1024)


def _vmem_estimate(tm, H, L_out, itemsize, out_itemsize, stack, v2_rows):
    # Per-grid-step live VMEM upper bound: double-buffered pipeline blocks,
    # stacked LHS scratch, product temporaries, f32 matmul result and epilogue.
    inputs = 2 * tm * H * itemsize + 2 * v2_rows * H * itemsize
    weights = 2 * H * L_out * itemsize            # W2T (pipeline double-buffers it)
    outputs = 2 * tm * L_out * out_itemsize
    lhs = stack * tm * H * itemsize               # stacked MXU LHS scratch
    prod_tmp = 2 * tm * H * itemsize              # v1*v2 / v1*v1 temporaries
    mm_res = stack * tm * L_out * 4               # f32 matmul result
    epilogue = 4 * tm * L_out * 4                 # num/n1sq/n2sq/den/out temps
    return inputs + weights + outputs + lhs + prod_tmp + mm_res + epilogue


def _pick_row_tile(B, S, H, L_out, itemsize, out_itemsize, stack, v2_is_2d):
    # Sublane quantum of the compute dtype (keeps loads/stores unmasked, no repack).
    q = {1: 32, 2: 16}.get(itemsize, 8)
    if S <= q:
        return S  # single full-extent block (exempt from the multiple-of-8 rule)

    # Balanced seq tiles of <= ~512 rows, never larger than the array extent.
    n_tiles = _cdiv(S, 512)
    tm = _round_up(_cdiv(S, n_tiles), q)
    tm = min(tm, (S // q) * q)

    def est(t):
        return _vmem_estimate(t, H, L_out, itemsize, out_itemsize, stack,
                              1 if v2_is_2d else t)

    while tm > q and est(tm) > _VMEM_BUDGET:
        tm = max(q, ((tm // 2) // q) * q)
    # v7x megacore: both TensorCores need work -> at least 2 grid steps if possible.
    while B * _cdiv(S, tm) < 2 and tm > q:
        tm = max(q, ((tm // 2) // q) * q)
    return tm


def _layer_match_kernel(v1_ref, v2_ref, w2t_ref, o_ref, lhs_ref, *, v2_is_2d):
    # v1_ref: (tm, H); v2_ref: (tm, H) or (1, H); w2t_ref: (H, L_out)
    # o_ref: (tm, L_out); lhs_ref: VMEM scratch ((2|3)*tm, H) in the compute dtype.
    tm = v1_ref.shape[0]
    v1 = v1_ref[...]
    v2 = v2_ref[...]
    w2t = w2t_ref[...]

    lhs_ref[0:tm, :] = v1 * v2               # broadcasts over rows in the 2-D path
    lhs_ref[tm:2 * tm, :] = v1 * v1
    if not v2_is_2d:
        lhs_ref[2 * tm:3 * tm, :] = v2 * v2

    res = jnp.dot(lhs_ref[...], w2t, preferred_element_type=jnp.float32)
    num = res[0:tm, :]
    n1sq = res[tm:2 * tm, :]
    if v2_is_2d:
        # v2 shared across the whole seq tile: one (1,H)@(H,L_out) row instead of
        # tm redundant MXU rows + scratch traffic; broadcast in the epilogue.
        n2sq = jnp.dot(v2 * v2, w2t, preferred_element_type=jnp.float32)   # (1, L_out)
    else:
        n2sq = res[2 * tm:3 * tm, :]

    # num / max(||w*v1|| * ||w*v2||, eps).  sqrt-before-product avoids the f32
    # overflow that max(n1sq*n2sq, eps^2) could hit for large-magnitude inputs.
    den = jnp.maximum(jnp.sqrt(n1sq) * jnp.sqrt(n2sq), _EPS)
    o_ref[...] = (num / den).astype(o_ref.dtype)


@jax.jit
def layer_match(v1, v2, w):
    """
    v1: (B, S, H)
    v2: (B, S, H) or (B, H)
    w : (L, H)
    returns: (B, S, L) in v1.dtype
    """
    B, S, H = v1.shape
    L = w.shape[0]
    compute_dtype = v1.dtype
    itemsize = jnp.dtype(compute_dtype).itemsize
    out_dtype = compute_dtype
    out_itemsize = jnp.dtype(out_dtype).itemsize

    v2_is_2d = (v2.ndim == 2)
    stack = 2 if v2_is_2d else 3

    # Lane-dense output: pad perspectives to a multiple of 128 only when the
    # padded writeback stays at or below the per-row v1 input stream.
    L128 = _round_up(L, 128)
    pad_L = (L % 128 != 0) and (L128 * out_itemsize <= H * itemsize)
    L_out = L128 if pad_L else L

    tm = _pick_row_tile(B, S, H, L_out, itemsize, out_itemsize, stack, v2_is_2d)
    n_seq = _cdiv(S, tm)
    grid = (B, n_seq)

    # Hoist W2T = (w*w).T once, zero-padded to L_out lanes, in the compute dtype.
    w32 = w.astype(jnp.float32)
    w2t = (w32 * w32).T.astype(compute_dtype)          # (H, L)
    if pad_L:
        w2t = jnp.pad(w2t, ((0, 0), (0, L_out - L)))

    if v2_is_2d:
        v2_in = v2.astype(compute_dtype).reshape(B, 1, H)
        v2_spec = pl.BlockSpec((pl.Squeezed(), 1, H), lambda b, i: (b, 0, 0))
    else:
        v2_in = v2.astype(compute_dtype)
        v2_spec = pl.BlockSpec((pl.Squeezed(), tm, H), lambda b, i: (b, i, 0))

    # Advisory cost estimate (kernel is HBM-bound; helps XLA schedule around it).
    n_tiles = B * n_seq
    lhs_rows = stack * tm + (8 if v2_is_2d else 0)
    flops = 2 * lhs_rows * H * L_out * n_tiles + 3 * tm * H * n_tiles + 6 * B * S * L_out
    transcendentals = 3 * B * S * L_out
    v2_bytes = B * H * itemsize if v2_is_2d else B * S * H * itemsize
    bytes_accessed = (B * S * H * itemsize + v2_bytes
                      + H * L_out * itemsize + B * S * L_out * out_itemsize)

    out = pl.pallas_call(
        functools.partial(_layer_match_kernel, v2_is_2d=v2_is_2d),
        out_shape=jax.ShapeDtypeStruct((B, S, L_out), out_dtype),
        grid_spec=pltpu.PrefetchScalarGridSpec(
            num_scalar_prefetch=0,
            grid=grid,
            in_specs=[
                pl.BlockSpec((pl.Squeezed(), tm, H), lambda b, i: (b, i, 0)),
                v2_spec,
                pl.BlockSpec((H, L_out), lambda b, i: (0, 0)),
            ],
            out_specs=pl.BlockSpec((pl.Squeezed(), tm, L_out), lambda b, i: (b, i, 0)),
            scratch_shapes=[pltpu.VMEM((stack * tm, H), compute_dtype)],
        ),
        compiler_params=pltpu.CompilerParams(
            dimension_semantics=("parallel", "parallel"),
            vmem_limit_bytes=_VMEM_LIMIT,
        ),
        cost_estimate=pl.CostEstimate(
            flops=int(flops),
            transcendentals=int(transcendentals),
            bytes_accessed=int(bytes_accessed),
        ),
    )(v1.astype(compute_dtype), v2_in, w2t)

    return out[:, :, :L] if pad_L else out


def _layer_match_ref(v1, v2, w, eps=_EPS):
    # Pure-JAX reference (cosine similarity on weighted vectors), f32.
    if v2.ndim == 2:
        v2 = jnp.broadcast_to(v2[:, None, :], v1.shape)
    v1 = v1.astype(jnp.float32)
    v2 = v2.astype(jnp.float32)
    w = w.astype(jnp.float32)
    wv1 = w[None, None, :, :] * v1[..., None, :]        # (B, S, L, H)
    wv2 = w[None, None, :, :] * v2[..., None, :]        # (B, S, L, H)
    num = jnp.sum(wv1 * wv2, axis=-1)
    den = jnp.maximum(
        jnp.linalg.norm(wv1, axis=-1) * jnp.linalg.norm(wv2, axis=-1), eps
    )
    return num / den                                     # (B, S, L)


if __name__ == "__main__":
    key = jax.random.PRNGKey(0)

    # Case 1: small shapes, unpadded L, full-extent seq block.
    B, S, H, L = 2, 8, 32, 8
    k1, k2, k3, k4 = jax.random.split(key, 4)
    v1 = jax.random.normal(k1, (B, S, H), dtype=jnp.float32)
    v2_3d = jax.random.normal(k2, (B, S, H), dtype=jnp.float32)
    v2_2d = jax.random.normal(k3, (B, H), dtype=jnp.float32)
    w = jax.random.normal(k4, (L, H), dtype=jnp.float32)

    out_3d = jax.block_until_ready(layer_match(v1, v2_3d, w))
    out_2d = jax.block_until_ready(layer_match(v1, v2_2d, w))
    ref_3d = _layer_match_ref(v1, v2_3d, w)
    ref_2d = _layer_match_ref(v1, v2_2d, w)
    assert out_3d.shape == (B, S, L)
    assert out_2d.shape == (B, S, L)
    assert jnp.allclose(out_3d, ref_3d, atol=3e-5, rtol=3e-5)
    assert jnp.allclose(out_2d, ref_2d, atol=3e-5, rtol=3e-5)

    # Case 2: ragged seq tiles (S not a multiple of tm) + lane-dense padded L output.
    B2, S2, H2, L2 = 2, 20, 256, 16
    k5, k6, k7, k8 = jax.random.split(jax.random.PRNGKey(1), 4)
    v1b = jax.random.normal(k5, (B2, S2, H2), dtype=jnp.float32)
    v2b = jax.random.normal(k6, (B2, S2, H2), dtype=jnp.float32)
    v2c = jax.random.normal(k7, (B2, H2), dtype=jnp.float32)
    wb = jax.random.normal(k8, (L2, H2), dtype=jnp.float32)

    out_b = jax.block_until_ready(layer_match(v1b, v2b, wb))
    out_c = jax.block_until_ready(layer_match(v1b, v2c, wb))
    ref_b = _layer_match_ref(v1b, v2b, wb)
    ref_c = _layer_match_ref(v1b, v2c, wb)
    assert out_b.shape == (B2, S2, L2)
    assert out_c.shape == (B2, S2, L2)
    assert jnp.allclose(out_b, ref_b, atol=3e-5, rtol=3e-5)
    assert jnp.allclose(out_c, ref_c, atol=3e-5, rtol=3e-5)

    # Case 3: bf16 smoke test (bf16 MXU path, 16-row sublane quantum), loose tolerance.
    v1h = v1b.astype(jnp.bfloat16)
    v2h = v2b.astype(jnp.bfloat16)
    wh = wb.astype(jnp.bfloat16)
    out_h = jax.block_until_ready(layer_match(v1h, v2h, wh))
    assert out_h.shape == (B2, S2, L2)
    assert out_h.dtype == jnp.bfloat16
    assert jnp.allclose(out_h.astype(jnp.float32), ref_b, atol=3e-2, rtol=3e-2)

    print("KERNEL_OK")
</pallas_src>

<mosaic_0001>
module attributes {stable_mosaic.version = 11 : i64} {
  func.func @_layer_match_kernel(%arg0: i32, %arg1: i32, %arg2: memref<1x8x32xf32, #tpu.memory_space<vmem>>, %arg3: memref<1x8x32xf32, #tpu.memory_space<vmem>>, %arg4: memref<32x8xf32, #tpu.memory_space<vmem>>, %arg5: memref<1x8x8xf32, #tpu.memory_space<vmem>>, %arg6: memref<24x32xf32, #tpu.memory_space<vmem>>) attributes {dimension_semantics = [#tpu.dimension_semantics<parallel>, #tpu.dimension_semantics<parallel>], iteration_bounds = array<i64: 2, 1>, scalar_prefetch = 0 : i64, scratch_operands = 1 : i64, tpu.core_type = #tpu.core_type<tc>, window_params = [{transform_indices = @transform_0, window_bounds = array<i64: 1, 8, 32>}, {transform_indices = @transform_1, window_bounds = array<i64: 1, 8, 32>}, {pipeline_mode = #tpu.pipeline_mode<synchronous>, transform_indices = @transform_2, window_bounds = array<i64: 32, 8>}, {transform_indices = @transform_3, window_bounds = array<i64: 1, 8, 8>}]} {
    %c0 = arith.constant 0 : index
    %c0_0 = arith.constant 0 : index
    %c0_1 = arith.constant 0 : index
    %0 = vector.load %arg2[%c0, %c0_0, %c0_1] : memref<1x8x32xf32, #tpu.memory_space<vmem>>, vector<1x8x32xf32>
    %1 = vector.shape_cast %0 : vector<1x8x32xf32> to vector<8x32xf32>
    %c0_2 = arith.constant 0 : index
    %c0_3 = arith.constant 0 : index
    %c0_4 = arith.constant 0 : index
    %2 = vector.load %arg3[%c0_2, %c0_3, %c0_4] : memref<1x8x32xf32, #tpu.memory_space<vmem>>, vector<1x8x32xf32>
    %3 = vector.shape_cast %2 : vector<1x8x32xf32> to vector<8x32xf32>
    %c0_5 = arith.constant 0 : index
    %c0_6 = arith.constant 0 : index
    %4 = vector.load %arg4[%c0_5, %c0_6] : memref<32x8xf32, #tpu.memory_space<vmem>>, vector<32x8xf32>
    %5 = arith.mulf %1, %3 : vector<8x32xf32>
    %c0_7 = arith.constant 0 : index
    %c0_8 = arith.constant 0 : index
    %6 = vector.load %arg6[%c0_7, %c0_8] : memref<24x32xf32, #tpu.memory_space<vmem>>, vector<8x32xf32>
    tpu.vector_store %arg6[%c0_7, %c0_8], %5 {strides = array<i32>} : memref<24x32xf32, #tpu.memory_space<vmem>>, vector<8x32xf32>,
    %7 = arith.mulf %1, %1 : vector<8x32xf32>
    %c8 = arith.constant 8 : index
    %c0_9 = arith.constant 0 : index
    %8 = vector.load %arg6[%c8, %c0_9] : memref<24x32xf32, #tpu.memory_space<vmem>>, vector<8x32xf32>
    tpu.vector_store %arg6[%c8, %c0_9], %7 {strides = array<i32>} : memref<24x32xf32, #tpu.memory_space<vmem>>, vector<8x32xf32>,
    %9 = arith.mulf %3, %3 : vector<8x32xf32>
    %c16 = arith.constant 16 : index
    %c0_10 = arith.constant 0 : index
    %10 = vector.load %arg6[%c16, %c0_10] : memref<24x32xf32, #tpu.memory_space<vmem>>, vector<8x32xf32>
    tpu.vector_store %arg6[%c16, %c0_10], %9 {strides = array<i32>} : memref<24x32xf32, #tpu.memory_space<vmem>>, vector<8x32xf32>,
    %c0_11 = arith.constant 0 : index
    %c0_12 = arith.constant 0 : index
    %11 = vector.load %arg6[%c0_11, %c0_12] : memref<24x32xf32, #tpu.memory_space<vmem>>, vector<24x32xf32>
    %cst = arith.constant dense<0.000000e+00> : vector<24x8xf32>
    %12 = tpu.matmul %11, %4, %cst {dimension_numbers = #tpu.dot_dimension_numbers<[1], [0], [0], [1], [0, 0, 1, 1], [], []>} : vector<24x32xf32>, vector<32x8xf32>, vector<24x8xf32> -> vector<24x8xf32>
    %13 = vector.extract_strided_slice %12 {offsets = [0, 0], sizes = [8, 8], strides = [1, 1]} : vector<24x8xf32> to vector<8x8xf32>
    %14 = vector.extract_strided_slice %12 {offsets = [8, 0], sizes = [8, 8], strides = [1, 1]} : vector<24x8xf32> to vector<8x8xf32>
    %15 = vector.extract_strided_slice %12 {offsets = [16, 0], sizes = [8, 8], strides = [1, 1]} : vector<24x8xf32> to vector<8x8xf32>
    %16 = math.sqrt %14 : vector<8x8xf32>
    %17 = math.sqrt %15 : vector<8x8xf32>
    %18 = arith.mulf %16, %17 : vector<8x8xf32>
    %cst_13 = arith.constant 9.99999993E-9 : f32
    %19 = vector.broadcast %cst_13 : f32 to vector<8x8xf32>
    %20 = arith.maximumf %18, %19 : vector<8x8xf32>
    %21 = arith.divf %13, %20 : vector<8x8xf32>
    %c0_14 = arith.constant 0 : index
    %c0_15 = arith.constant 0 : index
    %c0_16 = arith.constant 0 : index
    %22 = vector.load %arg5[%c0_14, %c0_15, %c0_16] : memref<1x8x8xf32, #tpu.memory_space<vmem>>, vector<1x8x8xf32>
    %23 = vector.shape_cast %22 : vector<1x8x8xf32> to vector<8x8xf32>
    %24 = vector.shape_cast %21 : vector<8x8xf32> to vector<1x8x8xf32>
    tpu.vector_store %arg5[%c0_14, %c0_15, %c0_16], %24 {strides = array<i32>} : memref<1x8x8xf32, #tpu.memory_space<vmem>>, vector<1x8x8xf32>,
    return
  }
  func.func @transform_0(%arg0: i32, %arg1: i32) -> (i32, i32, i32) {
    %c0_i32 = arith.constant 0 : i32
    %c0_i32_0 = arith.constant 0 : i32
    return %arg0, %arg1, %c0_i32 : i32, i32, i32
  }
  func.func @transform_1(%arg0: i32, %arg1: i32) -> (i32, i32, i32) {
    %c0_i32 = arith.constant 0 : i32
    %c0_i32_0 = arith.constant 0 : i32
    return %arg0, %arg1, %c0_i32 : i32, i32, i32
  }
  func.func @transform_2(%arg0: i32, %arg1: i32) -> (i32, i32) {
    %c0_i32 = arith.constant 0 : i32
    %c0_i32_0 = arith.constant 0 : i32
    %c0_i32_1 = arith.constant 0 : i32
    return %c0_i32, %c0_i32_0 : i32, i32
  }
  func.func @transform_3(%arg0: i32, %arg1: i32) -> (i32, i32, i32) {
    %c0_i32 = arith.constant 0 : i32
    %c0_i32_0 = arith.constant 0 : i32
    return %arg0, %arg1, %c0_i32 : i32, i32, i32
  }
}

</mosaic_0001>

<bundles_post_ra>
// kernel: mul.1
= control target key start
LH: loop header
LB: loop body
LE: loop exit
PB: predicated region body
PF: predicated region fallthrough
CT: control target
= control target key end

     0   :  { %3 = vsyncpa [#allocation1], 0  ;;  %s126_s0 = inlined_call_operand.hbm [shape: f32[8,32], index: 0, kind: input, shape index: {}, may-alias: {0,1}]   ;;  %s127_s1 = inlined_call_operand.hbm [shape: f32[8,32], index: 1, kind: input, shape index: {}, may-alias: {0,1}]   ;;  %s128_s2 = inlined_call_operand.vmem [shape: f32[8,32], index: 2, kind: output, shape index: {}]  }
   0x1   :  { %4 = vsyncpa [#allocation3], 0  ;;  %s82_s9 = smov [#allocation0]   ;;  %s83_s11 = smov [#allocation2]  }
   0x2   :  { %s9_s10 = sshll.u32 %s82_s9, 4  ;;  %s17_s12 = sshll.u32 %s83_s11, 4  ;;  %s10_s10 = int_to_ptr.vmem [resolvable:$true] %s9_s10  ;;  %s18_s12 = int_to_ptr.vmem [resolvable:$true] %s17_s12 }
   0x3   :  { %s34_s15 = scalar_lea.hbm %s126_s0, 128 }
   0x4   :  { %p35_p0 = scmp.ne.s32.totalorder %s126_s0, %s34_s15  ;;  %p38_p1 = scmp.lt.u32.totalorder %s34_s15, %s126_s0 }
   0x6   :  { %p40_p2 = pnand %p38_p1, %p35_p0 }
   0x8   :  { %43 = shalt.err (!%p40_p2)
}
   0x9   :  { %s44_s20 = scalar_lea.vmem %s10_s10, 128  ;;  %p49_p4 = scmp.lt.s32.totalorder %s10_s10, %s10_s10 }
   0xa   :  { %p45_p3 = scmp.ne.s32.totalorder %s10_s10, %s44_s20  ;;  %p50_p5 = scmp.lt.s32.totalorder %s44_s20, %s44_s20 }
   0xc   :  { %p51_p6 = por %p50_p5, %p49_p4 }
   0xe   :  { %p52_p7 = pnand %p51_p6, %p45_p3 }
  0x10   :  { %55 = shalt.err (!%p52_p7)
}
  0x11   :  { %12 = dma.hbm_to_vmem [thread:$0]  %s126_s0, 128, %s10_s10, [#allocation1]  }
  0x12   :  { %s56_s24 = scalar_lea.hbm %s127_s1, 128 }
  0x13   :  { %p57_p8 = scmp.ne.s32.totalorder %s127_s1, %s56_s24  ;;  %p60_p9 = scmp.lt.u32.totalorder %s56_s24, %s127_s1 }
  0x15   :  { %p62_p10 = pnand %p60_p9, %p57_p8 }
  0x17   :  { %65 = shalt.err (!%p62_p10)
}
  0x18   :  { %s66_s29 = scalar_lea.vmem %s18_s12, 128  ;;  %p71_p12 = scmp.lt.s32.totalorder %s18_s12, %s18_s12 }
  0x19   :  { %p67_p11 = scmp.ne.s32.totalorder %s18_s12, %s66_s29  ;;  %p72_p13 = scmp.lt.s32.totalorder %s66_s29, %s66_s29 }
  0x1b   :  { %p73_p0 = por %p72_p13, %p71_p12 }
  0x1d   :  { %p74_p1 = pnand %p73_p0, %p67_p11 }
  0x1f   :  { %77 = shalt.err (!%p74_p1)
}
  0x20   :  { %20 = dma.hbm_to_vmem [thread:$0]  %s127_s1, 128, %s18_s12, [#allocation3]  }
  0x21   :  { %78 = dma.done.wait [#allocation1], 128  }
  0x22   :  { %79 = vsyncadd [#allocation1], 4294967168 }
  0x23   :  { %80 = dma.done.wait [#allocation3], 128  }
  0x24   :  { %81 = vsyncadd [#allocation3], 4294967168  ;;  %v23_v0 = vld [vmem:[#allocation0] sm:$0xff]  ;;  %v24_v1 = vld [vmem:[#allocation2] sm:$0xff] }
  0x25   :  { %v27_v2 = vmul.f32 %v24_v1, %v23_v0 }
  0x27   :  { %29 = vst [vmem:[%s128_s2] sm:$0xff] %v27_v2 }
  0x28   :  { %30 = vsyncpa [#allocation1], 1 }
  0x29   :  { %31 = vsyncpa [#allocation3], 1 }

// kernel: layer_match.1
= control target key start
LH: loop header
LB: loop body
LE: loop exit
PB: predicated region body
PF: predicated region fallthrough
CT: control target
= control target key end

     0   :  { %8 = vsyncpa [#allocation4], 0  ;;  %s792_s0 = inlined_call_operand.vmem [shape: f32[2,8,32], index: 0, kind: input, shape index: {}]   ;;  %s793_s1 = inlined_call_operand.vmem [shape: f32[2,8,32], index: 1, kind: input, shape index: {}]   ;;  %s794_s2 = inlined_call_operand.vmem [shape: f32[32,8], index: 2, kind: input, shape index: {}]   ;;  %s795_s3 = inlined_call_operand.hbm [shape: f32[2,8,8], index: 3, kind: output, shape index: {}]  }
   0x1   :  { %10 = vsyncpa [#allocation4 + $0x1], 0  ;;  %s662_s12 = smov 0   ;;  %s664_s13 = smov 0  }
   0x2   :  { %s666_s14 = smov 0   ;;  %s668_s15 = smov 0  }
   0x3   :  { %s670_s16 = smov 0   ;;  %s672_s17 = smov 0  }
   0x4 LB: > { %s445_s18 = sadd.s32 4294967295, %s636_s17   ;;  %s446_s19 = sadd.s32 4294967294, %s636_s17   ;;  %s636_s17 = sphi %s672_s17, %s16_s17   ;;  %s632_s16 = sphi %s670_s16, %s802_s16   ;;  %s628_s15 = sphi %s668_s15, %s801_s15   ;;  %s624_s14 = sphi %s666_s14, %s800_s14   ;;  %s620_s13 = sphi %s664_s13, %s799_s13   ;;  %s616_s12 = sphi %s662_s12, %s798_s12  }
   0x5   : > { %s28_s20 = sadd.s32 1, %s632_s16  ;;  %s114_s21 = sadd.s32 1, %s624_s14 }
   0x6   : > { %p30_p0 = scmp.ge.s32.totalorder %s28_s20, 2  ;;  %p124_p1 = scmp.ne.s32.totalorder %s624_s14, %s620_s13 }
   0x7   : > { %p125_p2 = scmp.eq.s32.totalorder %s445_s18, 1  ;;  %p130_p3 = scmp.ne.s32.totalorder %s620_s13, %s616_s12 }
   0x8   : > { %s804_s20 = smov (%p30_p0, %s28_s20), 0  ;;  %p131_p5 = scmp.eq.s32.totalorder %s446_s19, 1 }
   0x9   : > { %p702_p4 = por %p125_p2, %p124_p1  ;;  %s109_s23 = ssub.s32 %s632_s16, %s804_s20 }
   0xa   : > { %p449_p6 = scmp.ge.s32.totalorder %s636_s17, 1  ;;  %p112_p7 = scmp.eq.s32.totalorder %s109_s23, 0 }
   0xb   : > { %p709_p8 = por %p131_p5, %p130_p3  ;;  %p172_p9 = scmp.lt.s32.totalorder %s636_s17, 3 }
   0xc   : > { %s715_s25 = scalar_select %p112_p7, %s624_s14, %s114_s21  }
   0xd   : > { %p173_p10 = pnand %p449_p6, %p172_p9 }
   0xe   : > { %v221_v0 = vld [vmem:[%s794_s2] sm:$0xff] (!%p173_p10)  ;;  %v222_v1 = vld [vmem:[%s794_s2 + $0x8] sm:$0xff] (!%p173_p10)  ;;  %v223_v2 = vld [vmem:[%s794_s2 + $0x10] sm:$0xff] (!%p173_p10)  ;;  %v638_v3 = vmov (!%p173_p10), 0.0|0.0   ;;  %vm639_vm0 = vmmov (!%p173_p10), 0   ;;  %v640_v6 = vmov (!%p173_p10), 0.0  }
   0xf   : > { %176 = sbr.rel (%p173_p10) target bundleno = 299 (0x12b), region = 32  ;;  %490 = vmatprep.subr.bf16.mxu1 (!%p173_p10), %v638_v3  ;;  %v485_v4 = vpack.c.bf16 (!%p173_p10), %v222_v1, %v221_v0  ;;  %v224_v5 = vld [vmem:[%s794_s2 + $0x18] sm:$0xff] (!%p173_p10)  ;;  %478 = vmatprep.mubr.msk.f32.mxu1 (!%p173_p10), %vm639_vm0, %v640_v6  ;;  %p205_p11 = scmp.lt.s32.totalorder (!%p173_p10), %s628_s15, 1  ;;  %vm226_vm1 = vcmask (!%p173_p10), 261120   ;;  %vm342_vm6 = vcmask (!%p173_p10), 64512  }
  0x10   : > { %484 = vmatprep.subr.bf16.mxu0 (!%p173_p10), %v638_v3  ;;  %475 = vmatprep.mubr.msk.f32.mxu0 (!%p173_p10), %vm639_vm0, %v640_v6  ;;  %v488_v7 = vpack.c.bf16 (!%p173_p10), %v224_v5, %v223_v2  ;;  %s202_s23 = sand.u32 (!%p173_p10), 1, %s620_s13   ;;  %s457_s27 = sshll.u32 (!%p173_p10), %s628_s15, 7 }
  0x11   : > { %492 = vmatpush3.bf16.msra.mxu1 (!%p173_p10), %v485_v4  ;;  %486 = vmatpush3.bf16.msra.mxu0 (!%p173_p10), %v485_v4  ;;  %s450_s26 = sshll.u32 (!%p173_p10), %s202_s23, 3  ;;  %s745_s5 = scalar_lea.hbm (!%p173_p10), %s795_s3, %s457_s27 }
  0x12   : > { %491 = vmatprep.subr.bf16.mxu1 (!%p173_p10), %v638_v3  ;;  %487 = vmatprep.subr.bf16.mxu0 (!%p173_p10), %v638_v3  ;;  %s204_s28 = scalar_lea.vmem (!%p173_p10), [#allocation3], %s450_s26  ;;  %s345_s6 = scalar_lea.sflag (!%p173_p10), [#allocation4], %s202_s23 }
  0x13   : > { %s359_s29 = sshll.u32 (!%p173_p10), %s204_s28, 4  ;;  %s747_s29 = int_to_ptr.vmem [resolvable:$true] %s359_s29 }
  0x15   : > { %493 = vmatpush3.bf16.msra.mxu1 (!%p173_p10), %v488_v7  ;;  %489 = vmatpush3.bf16.msra.mxu0 (!%p173_p10), %v488_v7 }
  0x16   : > { %s206_s7 = scalar_select %p205_p11, %s628_s15, 1 }
  0x17   : > { %s641_s15 = smov [#allocation3]  }
  0x18   : > { %s451_s8 = sshll.u32 %s206_s7, 3  ;;  %s558_s7 = scalar_lea.vmem %s747_s29, 128 }
  0x19   : > { %s211_s11 = scalar_lea.vmem %s792_s0, %s451_s8  ;;  %s218_s21 = scalar_lea.vmem %s793_s1, %s451_s8 }
  0x1a   : > { %v219_v8 = vld [vmem:[%s211_s11] sm:$0xff]  ;;  %p559_p12 = scmp.ne.s32.totalorder %s747_s29, %s558_s7  ;;  %s562_s8 = sshll.u32 %s641_s15, 4  ;;  %s563_s8 = int_to_ptr.vmem [resolvable:$false] %s562_s8 }
  0x1b   : > { %v220_v9 = vld [vmem:[%s218_s21] sm:$0xff]  ;;  %v228_v11 = vmul.f32 %v219_v8, %v219_v8  ;;  %s564_s9 = scalar_lea.vmem %s563_s8, 256  ;;  %p565_p1 = scmp.lt.s32.totalorder %s747_s29, %s563_s8 }
  0x1c   : > { %v225_v10 = vmul.f32 %v220_v9, %v219_v8  ;;  %v230_v12 = vmul.f32 %v220_v9, %v220_v9  ;;  %p560_p13 = pnand %p559_p12, %p702_p4  ;;  %p566_p2 = scmp.lt.s32.totalorder %s564_s9, %s558_s7 }
  0x1d   : > { %229 = vst.msk [vmem:[#allocation2 + $0x8] sm:$0xff] %vm226_vm1, %v228_v11 }
  0x1e   : > { %227 = vst.msk [vmem:[#allocation2] sm:$0xff] %vm226_vm1, %v225_v10  ;;  %231 = vst.msk [vmem:[#allocation2 + $0x10] sm:$0xff] %vm226_vm1, %v230_v12  ;;  %p561_p0 = pneg %p560_p13  ;;  %p567_p3 = por %p566_p2, %p565_p1 }
  0x20   : > { %p568_p5 = pnand %p567_p3, %p561_p0 }
  0x24   : > { %v233_v13 = vld [vmem:[#allocation2 + $0x8] sm:$0xff] }
  0x25   : > { %v232_v14 = vld [vmem:[#allocation2] sm:$0xff]  ;;  %479 = vmatmul.mubr.msk.f32.vlgmr.msra.gmra.mrb[0].mxu1 %vm226_vm1, %v233_v13  ;;  %v234_v15 = vld [vmem:[#allocation2 + $0x10] sm:$0xff] }
  0x26   : > { %476 = vmatmul.mubr.msk.f32.vlgmr.msra.gmra.mrb[0].mxu0 %vm226_vm1, %v232_v14  ;;  %481 = vmatprep.mubr.msk.f32.mxu1 %vm639_vm0, %v640_v6 }
  0x29   : > { %482 = vmatmul.mubr.msk.f32.gmra.mrb[2].mxu1 %vm226_vm1, %v234_v15 }
  0xf8   : > { %v315_v16 = vpop.f32.mrb[0].mxu1 }
  0xf9   : > { %v310_v17 = vpop.f32.mrb[0].mxu0  ;;  %552 = vrsqrt.f32 %v315_v16  ;;  %v480_v18 = vpop.f32.mrb[1].mxu1  ;;  %vm326_vm2 = vcmp.eq.f32.partialorder %v315_v16, inf  ;;  %v329_v27 = vand.u32 2147483648, %v315_v16  ;;  %vm328_vm4 = vcmp.eq.f32.partialorder %v315_v16, 0.0 }
  0xfa   : > { %v477_v19 = vpop.f32.mrb[1].mxu0 }
  0xfc   : > { %v320_v20 = vpop.f32.mrb[2].mxu1 }
  0xfd   : > { %554 = vrsqrt.f32 %v320_v20  ;;  %v483_v21 = vpop.f32.mrb[3].mxu1  ;;  %vm333_vm3 = vcmp.eq.f32.partialorder %v320_v20, inf  ;;  %v336_v28 = vand.u32 2147483648, %v320_v20  ;;  %vm335_vm5 = vcmp.eq.f32.partialorder %v320_v20, 0.0 }
 0x103   : > { %v553_v22 = vpop.eup %552 }
 0x104   : > { %v325_v23 = vmul.f32 %v553_v22, %v315_v16 }
 0x106   : > { %v327_v25 = vsel %vm326_vm2, %v315_v16, %v325_v23 }
 0x107   : > { %v555_v24 = vpop.eup %554  ;;  %v330_v30 = vsel %vm328_vm4, %v329_v27, %v327_v25 }
 0x108   : > { %v332_v26 = vmul.f32 %v555_v24, %v320_v20 }
 0x10a   : > { %v334_v29 = vsel %vm333_vm3, %v320_v20, %v332_v26 }
 0x10b   : > { %v337_v31 = vsel %vm335_vm5, %v336_v28, %v334_v29 }
 0x10c   : > { %v338_v32 = vmul.f32 %v337_v31, %v330_v30 }
 0x10e   : > { %v339_v33 = vmax.f32 %v338_v32, 1e-08 }
 0x110   : > { %556 = vrcp.f32 %v339_v33 }
 0x11a   : > { %v557_v34 = vpop.eup %556 }
 0x11b   : > { %v341_v35 = vmul.f32 %v557_v34, %v310_v17 }
 0x11d   : > { %343 = vst.msk [vmem:[%s204_s28] sm:$0xff] %vm342_vm6, %v341_v35 }
 0x11e   : > { %571 = shalt.err (!%p568_p5)
}
 0x11f   : > { %s572_s10 = scalar_lea.hbm %s745_s5, 128  ;;  %s576_s19 = scalar_lea.hbm %s795_s3, 256 }
 0x120   : > { %p573_p6 = scmp.ne.s32.totalorder %s745_s5, %s572_s10  ;;  %p577_p10 = scmp.lt.u32.totalorder %s745_s5, %s795_s3 }
 0x121   : > { %p578_p11 = scmp.lt.u32.totalorder %s576_s19, %s572_s10  ;;  %p580_p13 = scmp.lt.u32.totalorder %s572_s10, %s745_s5 }
 0x122   : > { %p574_p7 = pnand %p573_p6, %p702_p4 }
 0x123   : > { %p579_p12 = por %p578_p11, %p577_p10 }
 0x124   : > { %p575_p9 = pneg %p574_p7 }
 0x125   : > { %p581_p0 = por %p580_p13, %p579_p12 }
 0x127   : > { %p582_p1 = pnand %p581_p0, %p575_p9 }
 0x129   : > { %585 = shalt.err (!%p582_p1)
}
 0x12a   : > { %494 = dma.vmem_to_hbm [thread:$0]  (%p702_p4), %s747_s29, 128, %s745_s5, %s345_s6  }
 0x12b PF: > { %p500_p2 = scmp.ge.s32.totalorder %s636_s17, 2  ;;  %s371_s26 = sand.u32 1, %s616_s12  }
 0x12c   : > { %s372_s27 = scalar_lea.sflag [#allocation4], %s371_s26 }
 0x12d   : > { %p497_p3 = pnand %p500_p2, %p709_p8 }
 0x12f   : > { %611 = dma.done.wait (!%p497_p3), %s372_s27, 128  }
 0x130   : > { %613 = vsyncadd (!%p497_p3), %s372_s27, 4294967168  ;;  %s16_s17 = sadd.s32 1, %s636_s17   ;;  %s798_s12 = smov %s620_s13 }
 0x131   : > { %p13_p5 = scmp.ge.s32.totalorder %s16_s17, 4   ;;  %s799_s13 = smov %s624_s14 }
 0x132   : > { %s800_s14 = smov %s715_s25  ;;  %s801_s15 = smov %s632_s16 }
 0x133   : > { %s802_s16 = smov %s804_s20  ;;  %15 = sbr.rel (!%p13_p5) target bundleno = 4 (0x4), region = 70 }
 0x13a   :  { %377 = vsyncpa [#allocation4], 1 }
 0x13b   :  { %379 = vsyncpa [#allocation4 + $0x1], 1 }

</bundles_post_ra>
